<compile_context>
chip_gen: v6e
topology: v6e:2x2x1
jax: 0.10.0
libtpu: 0.0.40
codegen_flags: <defaults>
</compile_context>

<pallas_src>
import functools

import jax
import jax.numpy as jnp
from jax.experimental import pallas as pl
from jax.experimental.pallas import tpu as pltpu

EPS = 1e-5  # PyTorch BatchNorm2d default


def _ceil_div(a, b):
    return -(-a // b)


def _choose_tile_rows(n, h, in_row_bytes, out_row_bytes, budget_bytes):
    """Output-row tile height: as large as the VMEM budget allows, multiple of 8
    unless it covers all of H; guarantees >= 2 grid steps when possible (v7x)."""
    per_row = 2 * (in_row_bytes + out_row_bytes)      # double-buffered in + out
    th = max(8, budget_bytes // max(per_row, 1))
    th = min(th, h)
    if th < h:
        th = max(8, (th // 8) * 8)
    t = _ceil_div(h, th)
    if n * t < 2 and h > 8:                           # keep both v7x TCs busy
        th = max(8, (_ceil_div(h, 2) + 7) // 8 * 8)
        t = _ceil_div(h, th)
    return th, t


def _conv_tile(slab_ref, big_ref, th, kh):
    """3x3 conv over a row tile as KH matmuls against banded weights."""
    acc = jnp.dot(slab_ref[0:th, :], big_ref[0],
                  preferred_element_type=jnp.float32)
    for dh in range(1, kh):
        acc = acc + jnp.dot(slab_ref[dh:dh + th, :], big_ref[dh],
                            preferred_element_type=jnp.float32)
    return acc  # (th, W*Cout) f32


# ---- pass 1: conv tile -> per-(w,cout) lane partial sum / sum-of-squares ----
def _stats_kernel(slab_ref, big_ref, stats_ref, *, th, kh, h_valid):
    conv = _conv_tile(slab_ref, big_ref, th, kh)
    # Mask rows of a ragged last H tile out of the statistics.
    h0 = pl.program_id(1) * th
    row = h0 + jax.lax.broadcasted_iota(jnp.int32, conv.shape, 0)
    conv = jnp.where(row < h_valid, conv, 0.0)
    stats_ref[0:1, :] = jnp.sum(conv, axis=0, keepdims=True)
    stats_ref[1:2, :] = jnp.sum(conv * conv, axis=0, keepdims=True)


# ---- pass 2: recompute conv tile, folded BN (one FMA) + ReLU, exact store ----
def _conv_bn_relu_kernel(slab_ref, big_ref, scale_ref, shift_ref, out_ref, *, th, kh):
    conv = _conv_tile(slab_ref, big_ref, th, kh)
    out_ref[...] = jnp.maximum(conv * scale_ref[...] + shift_ref[...], 0.0)


def same_block_2d(x_nchw, weight, bias, gamma, beta, compute_dtype=jnp.bfloat16):
    """SameBlock2d forward. x: (N,Cin,H,W), weight: (Cout,Cin,KH,KW) -> (N,Cout,H,W).

    `bias` is accepted for API parity but unused: with training-mode batch
    statistics the conv bias cancels exactly in the BatchNorm mean subtraction.
    """
    del bias
    N, Cin, H, W = x_nchw.shape
    Cout, _, KH, KW = weight.shape
    ph, pw = KH // 2, KW // 2
    Wp = W + 2 * pw
    WpCin = Wp * Cin
    WCout = W * Cout
    f32 = jnp.float32
    in_bytes = jnp.dtype(compute_dtype).itemsize

    # ---- tiling over output rows -------------------------------------------
    th, T = _choose_tile_rows(N, H, WpCin * in_bytes, WCout * 4,
                              budget_bytes=8 * 1024 * 1024)
    Hpad = T * th

    # ---- input: padded NHWC with (w, cin) flattened into the lane dim -------
    x_nhwc = jnp.transpose(x_nchw, (0, 2, 3, 1)).astype(f32)
    x_pad = jnp.pad(x_nhwc, ((0, 0), (ph, ph + (Hpad - H)), (pw, pw), (0, 0)))
    x_rows = x_pad.reshape(N, Hpad + 2 * ph, WpCin).astype(compute_dtype)
    # Overlapping (th + 2*ph)-row slabs per tile: only 2/th duplicated halo rows,
    # and it keeps the input on the automatic double-buffered BlockSpec pipeline.
    row_idx = (jnp.arange(T) * th)[:, None] + jnp.arange(th + 2 * ph)[None, :]
    slabs = x_rows[:, row_idx, :]                      # (N, T, th+2ph, WpCin)

    # ---- banded ("Toeplitz") weight: conv == KH matmuls, no im2col ----------
    # big[dh, w'*Cin+ci, w*Cout+co] = weight[co, ci, dh, w'-w] for w'-w in [0, KW)
    # TODO(synk): this is O(W^2*Cin*Cout); for large W tile the W axis as well
    # (or fall back to in-VMEM im2col) to bound the weight-matrix size.
    k3 = jnp.transpose(weight, (2, 3, 1, 0)).reshape(KH, KW * Cin, Cout).astype(f32)
    rel = jnp.arange(WpCin)[:, None] - (jnp.arange(W) * Cin)[None, :]   # (WpCin, W)
    valid = (rel >= 0) & (rel < KW * Cin)
    big = jnp.where(valid[None, :, :, None],
                    k3[:, jnp.clip(rel, 0, KW * Cin - 1), :], 0.0)
    big = big.reshape(KH, WpCin, WCout).astype(compute_dtype)

    cparams = pltpu.CompilerParams(
        dimension_semantics=("parallel", "parallel"),
        vmem_limit_bytes=48 * 1024 * 1024)

    slab_spec = pl.BlockSpec((None, None, th + 2 * ph, WpCin),
                             lambda n, t: (n, t, 0, 0))
    big_spec = pl.BlockSpec((KH, WpCin, WCout), lambda n, t: (0, 0, 0))

    # ---- pass 1: per-tile partial BN statistics ------------------------------
    stats = pl.pallas_call(
        functools.partial(_stats_kernel, th=th, kh=KH, h_valid=H),
        out_shape=jax.ShapeDtypeStruct((N, T, 2, WCout), f32),
        grid_spec=pltpu.PrefetchScalarGridSpec(
            num_scalar_prefetch=0, grid=(N, T),
            in_specs=[slab_spec, big_spec],
            out_specs=pl.BlockSpec((None, None, 2, WCout),
                                   lambda n, t: (n, t, 0, 0))),
        compiler_params=cparams,
    )(slabs, big)

    # ---- tiny per-channel reduce + BN fold (plain JAX) -----------------------
    s2 = jnp.sum(stats, axis=(0, 1)).reshape(2, W, Cout).sum(axis=1)   # (2, Cout)
    count = float(N * H * W)
    mean = s2[0] / count
    # NOTE: E[x^2]-E[x]^2 in f32 is fine at these magnitudes; switch to centered
    # per-tile statistics if tolerances ever tighten (review concern).
    var = jnp.maximum(s2[1] / count - mean * mean, 0.0)   # biased (training) var
    inv_std = jax.lax.rsqrt(var + EPS)
    scale = gamma.astype(f32) * inv_std
    shift = beta.astype(f32) - mean * scale
    scale_p = jnp.tile(scale, W).reshape(1, WCout)        # per-(w,cout) lane
    shift_p = jnp.tile(shift, W).reshape(1, WCout)

    # ---- pass 2: recompute conv tile, folded BN + ReLU, lane-dense store -----
    out_rows = pl.pallas_call(
        functools.partial(_conv_bn_relu_kernel, th=th, kh=KH),
        out_shape=jax.ShapeDtypeStruct((N, Hpad, WCout), f32),
        grid_spec=pltpu.PrefetchScalarGridSpec(
            num_scalar_prefetch=0, grid=(N, T),
            in_specs=[slab_spec, big_spec,
                      pl.BlockSpec((1, WCout), lambda n, t: (0, 0)),
                      pl.BlockSpec((1, WCout), lambda n, t: (0, 0))],
            out_specs=pl.BlockSpec((None, th, WCout), lambda n, t: (n, t, 0))),
        compiler_params=cparams,
    )(slabs, big, scale_p, shift_p)

    out_nhwc = out_rows.reshape(N, Hpad, W, Cout)
    if Hpad != H:
        out_nhwc = out_nhwc[:, :H]
    # TODO(synk): return NHWC directly if the downstream consumer accepts it;
    # this transpose is one extra HBM round trip of the output.
    return jnp.transpose(out_nhwc, (0, 3, 1, 2))


def reference_same_block_2d(x_nchw, weight, bias, gamma, beta):
    """Pure-JAX reference (conv + bias + training-stat BN + ReLU)."""
    conv = jax.lax.conv_general_dilated(
        x_nchw.astype(jnp.float32), weight.astype(jnp.float32),
        window_strides=(1, 1), padding="SAME",
        dimension_numbers=("NCHW", "OIHW", "NCHW"))
    conv = conv + bias.reshape(1, -1, 1, 1)
    mean = jnp.mean(conv, axis=(0, 2, 3), keepdims=True)
    var = jnp.mean((conv - mean) ** 2, axis=(0, 2, 3), keepdims=True)
    normed = (conv - mean) * jax.lax.rsqrt(var + EPS)
    out = normed * gamma.reshape(1, -1, 1, 1) + beta.reshape(1, -1, 1, 1)
    return jnp.maximum(out, 0.0)


if __name__ == "__main__":
    # SameBlock2d(in_features=4, out_features=8, kernel_size=3, padding=1)
    N, Cin, H, W = 2, 4, 16, 16
    Cout, KH, KW = 8, 3, 3

    key = jax.random.PRNGKey(0)
    kx, kw, kb, kg, kbe = jax.random.split(key, 5)

    x = jax.random.normal(kx, (N, Cin, H, W), dtype=jnp.float32)
    weight = 0.1 * jax.random.normal(kw, (Cout, Cin, KH, KW), dtype=jnp.float32)
    bias = 0.1 * jax.random.normal(kb, (Cout,), dtype=jnp.float32)
    gamma = 1.0 + 0.1 * jax.random.normal(kg, (Cout,), dtype=jnp.float32)
    beta = 0.1 * jax.random.normal(kbe, (Cout,), dtype=jnp.float32)

    ref = reference_same_block_2d(x, weight, bias, gamma, beta)

    # f32 path: tight structural check of the kernel.
    out_f32 = jax.block_until_ready(
        same_block_2d(x, weight, bias, gamma, beta, compute_dtype=jnp.float32))
    assert out_f32.shape == (N, Cout, H, W)
    assert jnp.allclose(out_f32, ref, atol=1e-4, rtol=1e-4)

    # bf16 path (default / performance path): tolerance accounts for the cast.
    out_bf16 = jax.block_until_ready(same_block_2d(x, weight, bias, gamma, beta))
    assert out_bf16.shape == (N, Cout, H, W)
    assert jnp.allclose(out_bf16, ref, atol=3e-2, rtol=3e-2)

    print("KERNEL_OK")
</pallas_src>

<mosaic_0001>
module attributes {stable_mosaic.version = 11 : i64} {
  func.func @_stats_kernel(%arg0: i32, %arg1: i32, %arg2: memref<1x1x18x72xf32, #tpu.memory_space<vmem>>, %arg3: memref<3x72x128xf32, #tpu.memory_space<vmem>>, %arg4: memref<1x1x2x128xf32, #tpu.memory_space<vmem>>) attributes {dimension_semantics = [#tpu.dimension_semantics<parallel>, #tpu.dimension_semantics<parallel>], iteration_bounds = array<i64: 2, 1>, scalar_prefetch = 0 : i64, scratch_operands = 0 : i64, tpu.core_type = #tpu.core_type<tc>, window_params = [{transform_indices = @transform_0, window_bounds = array<i64: 1, 1, 18, 72>}, {pipeline_mode = #tpu.pipeline_mode<synchronous>, transform_indices = @transform_1, window_bounds = array<i64: 3, 72, 128>}, {transform_indices = @transform_2, window_bounds = array<i64: 1, 1, 2, 128>}]} {
    %c0 = arith.constant 0 : index
    %c0_0 = arith.constant 0 : index
    %c0_1 = arith.constant 0 : index
    %c0_2 = arith.constant 0 : index
    %0 = vector.load %arg2[%c0, %c0_0, %c0_1, %c0_2] : memref<1x1x18x72xf32, #tpu.memory_space<vmem>>, vector<1x1x16x72xf32>
    %1 = vector.shape_cast %0 : vector<1x1x16x72xf32> to vector<16x72xf32>
    %c0_3 = arith.constant 0 : index
    %c0_4 = arith.constant 0 : index
    %c0_5 = arith.constant 0 : index
    %2 = vector.load %arg3[%c0_3, %c0_4, %c0_5] : memref<3x72x128xf32, #tpu.memory_space<vmem>>, vector<1x72x128xf32>
    %3 = vector.shape_cast %2 : vector<1x72x128xf32> to vector<72x128xf32>
    %cst = arith.constant dense<0.000000e+00> : vector<16x128xf32>
    %4 = tpu.matmul %1, %3, %cst {dimension_numbers = #tpu.dot_dimension_numbers<[1], [0], [0], [1], [0, 0, 1, 1], [], []>} : vector<16x72xf32>, vector<72x128xf32>, vector<16x128xf32> -> vector<16x128xf32>
    %c0_6 = arith.constant 0 : index
    %c0_7 = arith.constant 0 : index
    %c1 = arith.constant 1 : index
    %c0_8 = arith.constant 0 : index
    %5 = vector.load %arg2[%c0_6, %c0_7, %c1, %c0_8] : memref<1x1x18x72xf32, #tpu.memory_space<vmem>>, vector<1x1x16x72xf32>
    %6 = vector.shape_cast %5 : vector<1x1x16x72xf32> to vector<16x72xf32>
    %c1_9 = arith.constant 1 : index
    %c0_10 = arith.constant 0 : index
    %c0_11 = arith.constant 0 : index
    %7 = vector.load %arg3[%c1_9, %c0_10, %c0_11] : memref<3x72x128xf32, #tpu.memory_space<vmem>>, vector<1x72x128xf32>
    %8 = vector.shape_cast %7 : vector<1x72x128xf32> to vector<72x128xf32>
    %cst_12 = arith.constant dense<0.000000e+00> : vector<16x128xf32>
    %9 = tpu.matmul %6, %8, %cst_12 {dimension_numbers = #tpu.dot_dimension_numbers<[1], [0], [0], [1], [0, 0, 1, 1], [], []>} : vector<16x72xf32>, vector<72x128xf32>, vector<16x128xf32> -> vector<16x128xf32>
    %10 = arith.addf %4, %9 : vector<16x128xf32>
    %c0_13 = arith.constant 0 : index
    %c0_14 = arith.constant 0 : index
    %c2 = arith.constant 2 : index
    %c0_15 = arith.constant 0 : index
    %11 = vector.load %arg2[%c0_13, %c0_14, %c2, %c0_15] : memref<1x1x18x72xf32, #tpu.memory_space<vmem>>, vector<1x1x16x72xf32>
    %12 = vector.shape_cast %11 : vector<1x1x16x72xf32> to vector<16x72xf32>
    %c2_16 = arith.constant 2 : index
    %c0_17 = arith.constant 0 : index
    %c0_18 = arith.constant 0 : index
    %13 = vector.load %arg3[%c2_16, %c0_17, %c0_18] : memref<3x72x128xf32, #tpu.memory_space<vmem>>, vector<1x72x128xf32>
    %14 = vector.shape_cast %13 : vector<1x72x128xf32> to vector<72x128xf32>
    %cst_19 = arith.constant dense<0.000000e+00> : vector<16x128xf32>
    %15 = tpu.matmul %12, %14, %cst_19 {dimension_numbers = #tpu.dot_dimension_numbers<[1], [0], [0], [1], [0, 0, 1, 1], [], []>} : vector<16x72xf32>, vector<72x128xf32>, vector<16x128xf32> -> vector<16x128xf32>
    %16 = arith.addf %10, %15 : vector<16x128xf32>
    %c16_i32 = arith.constant 16 : i32
    %17 = arith.muli %arg1, %c16_i32 : i32
    %18 = tpu.iota {dimensions = array<i32: 0>} : vector<16x128xi32>
    %19 = vector.broadcast %17 : i32 to vector<16x128xi32>
    %20 = arith.addi %19, %18 : vector<16x128xi32>
    %c16_i32_20 = arith.constant 16 : i32
    %21 = vector.broadcast %c16_i32_20 : i32 to vector<16x128xi32>
    %22 = arith.cmpi slt, %20, %21 : vector<16x128xi32>
    %cst_21 = arith.constant 0.000000e+00 : f32
    %23 = vector.broadcast %cst_21 : f32 to vector<16x128xf32>
    %24 = arith.select %22, %16, %23 : vector<16x128xi1>, vector<16x128xf32>
    %cst_22 = arith.constant dense<0.000000e+00> : vector<128xf32>
    %25 = vector.multi_reduction <add>, %24, %cst_22 [0] : vector<16x128xf32> to vector<128xf32>
    %26 = vector.shape_cast %25 : vector<128xf32> to vector<1x128xf32>
    %c0_23 = arith.constant 0 : index
    %c0_24 = arith.constant 0 : index
    %c0_25 = arith.constant 0 : index
    %c0_26 = arith.constant 0 : index
    %27 = vector.load %arg4[%c0_23, %c0_24, %c0_25, %c0_26] : memref<1x1x2x128xf32, #tpu.memory_space<vmem>>, vector<1x1x1x128xf32>
    %28 = vector.shape_cast %27 : vector<1x1x1x128xf32> to vector<1x128xf32>
    %29 = vector.shape_cast %26 : vector<1x128xf32> to vector<1x1x1x128xf32>
    tpu.vector_store %arg4[%c0_23, %c0_24, %c0_25, %c0_26], %29 {strides = array<i32>} : memref<1x1x2x128xf32, #tpu.memory_space<vmem>>, vector<1x1x1x128xf32>,
    %30 = arith.mulf %24, %24 : vector<16x128xf32>
    %cst_27 = arith.constant dense<0.000000e+00> : vector<128xf32>
    %31 = vector.multi_reduction <add>, %30, %cst_27 [0] : vector<16x128xf32> to vector<128xf32>
    %32 = vector.shape_cast %31 : vector<128xf32> to vector<1x128xf32>
    %c0_28 = arith.constant 0 : index
    %c0_29 = arith.constant 0 : index
    %c1_30 = arith.constant 1 : index
    %c0_31 = arith.constant 0 : index
    %33 = vector.load %arg4[%c0_28, %c0_29, %c1_30, %c0_31] : memref<1x1x2x128xf32, #tpu.memory_space<vmem>>, vector<1x1x1x128xf32>
    %34 = vector.shape_cast %33 : vector<1x1x1x128xf32> to vector<1x128xf32>
    %35 = vector.shape_cast %32 : vector<1x128xf32> to vector<1x1x1x128xf32>
    tpu.vector_store %arg4[%c0_28, %c0_29, %c1_30, %c0_31], %35 {strides = array<i32>} : memref<1x1x2x128xf32, #tpu.memory_space<vmem>>, vector<1x1x1x128xf32>,
    return
  }
  func.func @transform_0(%arg0: i32, %arg1: i32) -> (i32, i32, i32, i32) {
    %c0_i32 = arith.constant 0 : i32
    %c0_i32_0 = arith.constant 0 : i32
    %c0_i32_1 = arith.constant 0 : i32
    return %arg0, %arg1, %c0_i32, %c0_i32_0 : i32, i32, i32, i32
  }
  func.func @transform_1(%arg0: i32, %arg1: i32) -> (i32, i32, i32) {
    %c0_i32 = arith.constant 0 : i32
    %c0_i32_0 = arith.constant 0 : i32
    %c0_i32_1 = arith.constant 0 : i32
    %c0_i32_2 = arith.constant 0 : i32
    return %c0_i32, %c0_i32_0, %c0_i32_1 : i32, i32, i32
  }
  func.func @transform_2(%arg0: i32, %arg1: i32) -> (i32, i32, i32, i32) {
    %c0_i32 = arith.constant 0 : i32
    %c0_i32_0 = arith.constant 0 : i32
    %c0_i32_1 = arith.constant 0 : i32
    return %arg0, %arg1, %c0_i32, %c0_i32_0 : i32, i32, i32, i32
  }
}

</mosaic_0001>

<bundles_post_ra>
// kernel: tpu_custom_call.1
= control target key start
LH: loop header
LB: loop body
LE: loop exit
PB: predicated region body
PF: predicated region fallthrough
CT: control target
= control target key end

     0   :  { %7 = vsyncpa [#allocation3], 0  ;;  %s1046_s0 = inlined_call_operand.vmem [shape: f32[2,1,18,72], index: 0, kind: input, shape index: {}]   ;;  %s1047_s1 = inlined_call_operand.hbm [shape: f32[3,72,128], index: 1, kind: input, shape index: {}]   ;;  %s1048_s2 = inlined_call_operand.hbm [shape: f32[2,1,2,128], index: 2, kind: output, shape index: {}]  }
   0x1   :  { %8 = vsyncpa [#allocation4], 0 }
   0x2   :  { %10 = vsyncpa [#allocation4 + $0x1], 0  ;;  %s910_s9 = smov 0   ;;  %s912_s10 = smov 0  }
   0x3   :  { %s914_s11 = smov 0   ;;  %s916_s12 = smov 0  }
   0x4   :  { %s918_s13 = smov 0   ;;  %s920_s14 = smov 0  }
   0x5 LB: > { %s599_s15 = sadd.s32 4294967295, %s889_s14   ;;  %s600_s16 = sadd.s32 4294967294, %s889_s14   ;;  %s889_s14 = sphi %s920_s14, %s16_s14   ;;  %s885_s13 = sphi %s918_s13, %s1057_s13   ;;  %s881_s12 = sphi %s916_s12, %s1056_s12   ;;  %s877_s11 = sphi %s914_s11, %s1055_s11   ;;  %s873_s10 = sphi %s912_s10, %s1054_s10   ;;  %s869_s9 = sphi %s910_s9, %s1053_s9  }
   0x6   : > { %s28_s17 = sadd.s32 1, %s885_s13  ;;  %s86_s18 = sadd.s32 1, %s877_s11 }
   0x7   : > { %p30_p0 = scmp.ge.s32.totalorder %s28_s17, 2  ;;  %p96_p1 = scmp.ne.s32.totalorder %s877_s11, %s873_s10 }
   0x8   : > { %p97_p2 = scmp.eq.s32.totalorder %s599_s15, 1  ;;  %p102_p3 = scmp.ne.s32.totalorder %s873_s10, %s869_s9 }
   0x9   : > { %s1059_s17 = smov (%p30_p0, %s28_s17), 0  ;;  %p103_p5 = scmp.eq.s32.totalorder %s600_s16, 1 }
   0xa   : > { %p950_p4 = por %p97_p2, %p96_p1  ;;  %s81_s20 = ssub.s32 %s885_s13, %s1059_s17 }
   0xb   : > { %p601_p6 = scmp.ge.s32.totalorder %s889_s14, 1  ;;  %p84_p7 = scmp.eq.s32.totalorder %s81_s20, 0 }
   0xc   : > { %p957_p8 = por %p103_p5, %p102_p3  ;;  %p110_p9 = scmp.lt.s32.totalorder %s889_s14, 3 }
   0xd   : > { %s963_s22 = scalar_select %p84_p7, %s877_s11, %s86_s18  }
   0xe   : > { %p965_p10 = pnand %p601_p6, %p110_p9  ;;  %p969_p11 = scmp.eq.s32.totalorder %s599_s15, 0 }
   0xf   : > { %s891_s25 = smov [#allocation2]  }
  0x10   : > { %p721_p12 = pneg %p965_p10  ;;  %s122_s26 = sshll.u32 %s891_s25, 4  ;;  %s123_s26 = int_to_ptr.vmem [resolvable:$true] %s122_s26 }
  0x11   : > { %s794_s27 = scalar_lea.vmem %s123_s26, 3456  ;;  %p802_p5 = scmp.lt.s32.totalorder %s123_s26, %s123_s26 }
  0x12   : > { %p722_p13 = pnand %p969_p11, %p721_p12  ;;  %p795_p1 = scmp.ne.s32.totalorder %s123_s26, %s794_s27 }
  0x13   : > { %p803_p6 = scmp.lt.s32.totalorder %s794_s27, %s794_s27 }
  0x14   : > { %p785_p0 = pneg %p722_p13 }
  0x15   : > { %p804_p7 = por %p803_p6, %p802_p5 }
  0x16   : > { %p797_p2 = pnand %p795_p1, %p785_p0 }
  0x18   : > { %p798_p3 = pneg %p797_p2 }
  0x1a   : > { %p805_p9 = pnand %p804_p7, %p798_p3 }
  0x1c   : > { %808 = shalt.err (!%p805_p9)
}
  0x1d   : > { %s892_s28 = smov 128   ;;  %s893_s29 = smov 8  }
  0x1e   : > { %724 = dma.hbm_to_vmem [thread:$0]  (!%p722_p13), %s1047_s1, 3456, %s123_s26, [#allocation3], %s892_s28, %s892_s28, %s893_s29  }
  0x1f   : > { %150 = sbr.rel (%p965_p10) target bundleno = 302 (0x12e), region = 28 }
  0x24   : > { %860 = dma.done.wait (%p969_p11), [#allocation3], 3456  }
  0x25   : > { %862 = vsyncadd (%p969_p11), [#allocation3], 4294963840  ;;  %v207_v0 = vld [vmem:[#allocation2 + $0x88] sm:$0xff]  ;;  %v195_v1 = vld [vmem:[#allocation2 + $0x40] sm:$0xff]  ;;  %p176_p12 = scmp.lt.s32.totalorder %s881_s12, 1  ;;  %vm208_vm0 = vcmask 588800  }
  0x26   : > { %v206_v2 = vld [vmem:[#allocation2 + $0x80] sm:$0xff]  ;;  %651 = vmatprep.subr.mxu0 %v207_v0  ;;  %672 = vmatprep.subr.mxu1 %v195_v1  ;;  %v194_v3 = vld [vmem:[#allocation2 + $0x38] sm:$0xff]  ;;  %v193_v5 = vld [vmem:[#allocation2 + $0x30] sm:$0xff]  ;;  %s173_s15 = sand.u32 1, %s873_s10   ;;  %s615_s18 = sshll.u32 %s881_s12, 5 }
  0x27   : > { %652 = vmatpush3.msra.mxu0 %v207_v0  ;;  %673 = vmatpush3.msra.mxu1 %v195_v1  ;;  %v205_v4 = vld [vmem:[#allocation2 + $0x78] sm:$0xff]  ;;  %v204_v6 = vld [vmem:[#allocation2 + $0x70] sm:$0xff]  ;;  %v192_v7 = vld [vmem:[#allocation2 + $0x28] sm:$0xff]  ;;  %s177_s4 = scalar_select %p176_p12, %s881_s12, 1 }
  0x28   : > { %653 = vmatprep.subr.mxu0 %v206_v2  ;;  %674 = vmatprep.subr.mxu1 %v194_v3  ;;  %v203_v8 = vld [vmem:[#allocation2 + $0x68] sm:$0xff]  ;;  %v191_v9 = vld [vmem:[#allocation2 + $0x20] sm:$0xff]  ;;  %v190_v11 = vld [vmem:[#allocation2 + $0x18] sm:$0xff]  ;;  %s606_s16 = sshll.u32 %s173_s15, 1  ;;  %s508_s26 = scalar_lea.hbm %s1048_s2, %s615_s18 }
  0x29   : > { %654 = vmatpush3.msra.mxu0 %v206_v2  ;;  %675 = vmatpush3.msra.mxu1 %v194_v3  ;;  %v202_v10 = vld [vmem:[#allocation2 + $0x60] sm:$0xff]  ;;  %s714_s5 = smul.u32 24, %s177_s4  ;;  %v201_v12 = vld [vmem:[#allocation2 + $0x58] sm:$0xff]  ;;  %v189_v13 = vld [vmem:[#allocation2 + $0x10] sm:$0xff]  ;;  %s175_s20 = scalar_lea.vmem [#allocation5], %s606_s16 }
  0x2a   : > { %655 = vmatprep.subr.mxu0 %v205_v4  ;;  %676 = vmatprep.subr.mxu1 %v193_v5  ;;  %v200_v14 = vld [vmem:[#allocation2 + $0x50] sm:$0xff]  ;;  %v188_v15 = vld [vmem:[#allocation2 + $0x8] sm:$0xff]  ;;  %v187_v17 = vld [vmem:[#allocation2] sm:$0xff]  ;;  %s510_s23 = sshll.u32 %s175_s20, 4  ;;  %s496_s27 = scalar_lea.sflag [#allocation4], %s173_s15  ;;  %s511_s23 = int_to_ptr.vmem [resolvable:$true] %s510_s23 }
  0x2b   : > { %656 = vmatpush3.msra.mxu0 %v205_v4  ;;  %677 = vmatpush3.msra.mxu1 %v193_v5  ;;  %s993_s8 = scalar_lea.vmem %s1046_s0, %s714_s5  ;;  %v199_v16 = vld [vmem:[#allocation2 + $0x48] sm:$0xff]  ;;  %v382_v22 = vld [vmem:[#allocation2 + $0xd0] sm:$0xff]  ;;  %v380_v25 = vld [vmem:[#allocation2 + $0xc0] sm:$0xff]  ;;  %s809_s28 = scalar_lea.vmem %s511_s23, 32 }
  0x2c   : > { %657 = vmatprep.subr.mxu0 %v204_v6  ;;  %678 = vmatprep.subr.mxu1 %v192_v7  ;;  %v196_v18 = vld [vmem:[%s993_s8 + $0x1] sm:$0xff]  ;;  %v197_v20 = vld [vmem:[%s993_s8 + $0x9] sm:$0xff]  ;;  %v379_v26 = vld [vmem:[#allocation2 + $0xb8] sm:$0xff]  ;;  %p810_p10 = scmp.ne.s32.totalorder %s511_s23, %s809_s28  ;;  %s894_s29 = smov [#allocation5]  }
  0x2d   : > { %658 = vmatpush3.msra.mxu0 %v204_v6  ;;  %679 = vmatpush3.msra.mxu1 %v192_v7  ;;  %v185_v19 = vld [vmem:[%s993_s8] sm:$0xff]  ;;  %v186_v21 = vld [vmem:[%s993_s8 + $0x8] sm:$0xff]  ;;  %v378_v27 = vld [vmem:[#allocation2 + $0xb0] sm:$0xff]  ;;  %s813_s12 = sshll.u32 %s894_s29, 4  ;;  %s814_s12 = int_to_ptr.vmem [resolvable:$false] %s813_s12 }
  0x2e   : > { %659 = vmatprep.subr.mxu0 %v203_v8  ;;  %680 = vmatprep.subr.mxu1 %v191_v9  ;;  %v371_v23 = vld [vmem:[%s993_s8 + $0x2] sm:$0xff]  ;;  %v375_v30 = vld [vmem:[#allocation2 + $0x98] sm:$0xff]  ;;  %v374_v31 = vld [vmem:[#allocation2 + $0x90] sm:$0xff]  ;;  %p811_p11 = pnand %p810_p10, %p950_p4  ;;  %s815_s30 = scalar_lea.vmem %s814_s12, 64 }
  0x2f   : > { %660 = vmatpush3.msra.mxu0 %v203_v8  ;;  %681 = vmatpush3.msra.mxu1 %v191_v9  ;;  %v381_v24 = vld [vmem:[#allocation2 + $0xc8] sm:$0xff]  ;;  %v376_v29 = vld [vmem:[#allocation2 + $0xa0] sm:$0xff]  ;;  %p816_p0 = scmp.lt.s32.totalorder %s511_s23, %s814_s12  ;;  %p817_p1 = scmp.lt.s32.totalorder %s815_s30, %s809_s28 }
  0x30   : > { %661 = vmatprep.subr.mxu0 %v202_v10  ;;  %682 = vmatprep.subr.mxu1 %v190_v11  ;;  %v377_v28 = vld [vmem:[#allocation2 + $0xa8] sm:$0xff]  ;;  %p812_p13 = pneg %p811_p11 }
  0x31   : > { %662 = vmatpush3.msra.mxu0 %v202_v10  ;;  %683 = vmatpush3.msra.mxu1 %v190_v11  ;;  %v372_v32 = vld [vmem:[%s993_s8 + $0xa] sm:$0xff]  ;;  %p818_p2 = por %p817_p1, %p816_p0 }
  0x32   : > { %663 = vmatprep.subr.mxu0 %v201_v12  ;;  %684 = vmatprep.subr.mxu1 %v189_v13 }
  0x33   : > { %664 = vmatpush3.msra.mxu0 %v201_v12  ;;  %685 = vmatpush3.msra.mxu1 %v189_v13  ;;  %p819_p3 = pnand %p818_p2, %p812_p13 }
  0x34   : > { %665 = vmatprep.subr.mxu0 %v200_v14  ;;  %686 = vmatprep.subr.mxu1 %v188_v15 }
  0x35   : > { %666 = vmatpush3.msra.mxu0 %v200_v14  ;;  %687 = vmatpush3.msra.mxu1 %v188_v15 }
  0x36   : > { %667 = vmatprep.subr.mxu0 %v199_v16  ;;  %688 = vmatprep.subr.mxu1 %v187_v17 }
  0x37   : > { %668 = vmatpush3.msra.mxu0 %v199_v16  ;;  %669 = vmatprep.mubr.msk.f32.mxu0 %vm208_vm0, %v196_v18 }
  0x38   : > { %689 = vmatpush3.msra.mxu1 %v187_v17  ;;  %690 = vmatprep.mubr.msk.f32.mxu1 %vm208_vm0, %v185_v19 }
  0x39   : > { %670 = vmatmul.mubr.msk.f32.vlgmr.msra.gmra.mxu0 %vm208_vm0, %v197_v20  ;;  %691 = vmatmul.mubr.msk.f32.vlgmr.msra.gmra.mxu1 %vm208_vm0, %v186_v21 }
  0x3a   : > { %693 = vmatprep.subr.mxu0 %v382_v22  ;;  %711 = vmatprep.mubr.msk.f32.mxu0 %vm208_vm0, %v371_v23 }
  0x3b   : > { %694 = vmatpush3.msra.mxu0 %v382_v22 }
  0x3c   : > { %695 = vmatprep.subr.mxu0 %v381_v24 }
  0x3d   : > { %696 = vmatpush3.msra.mxu0 %v381_v24 }
  0x3e   : > { %697 = vmatprep.subr.mxu0 %v380_v25 }
  0x3f   : > { %698 = vmatpush3.msra.mxu0 %v380_v25 }
  0x40   : > { %699 = vmatprep.subr.mxu0 %v379_v26 }
  0x41   : > { %700 = vmatpush3.msra.mxu0 %v379_v26 }
  0x42   : > { %701 = vmatprep.subr.mxu0 %v378_v27 }
  0x43   : > { %702 = vmatpush3.msra.mxu0 %v378_v27 }
  0x44   : > { %703 = vmatprep.subr.mxu0 %v377_v28 }
  0x45   : > { %704 = vmatpush3.msra.mxu0 %v377_v28 }
  0x46   : > { %705 = vmatprep.subr.mxu0 %v376_v29 }
  0x47   : > { %706 = vmatpush3.msra.mxu0 %v376_v29 }
  0x48   : > { %707 = vmatprep.subr.mxu0 %v375_v30 }
  0x49   : > { %708 = vmatpush3.msra.mxu0 %v375_v30 }
  0x4a   : > { %709 = vmatprep.subr.mxu0 %v374_v31 }
  0x4b   : > { %710 = vmatpush3.msra.mxu0 %v374_v31 }
  0x4c   : > { %712 = vmatmul.mubr.msk.f32.vlgmr.msra.gmra.mxu0 %vm208_vm0, %v372_v32 }
  0xf9   : > { %v671_v33 = vpop.f32.mrf.mxu0  ;;  %v692_v34 = vpop.f32.mrf.mxu1 }
  0xfa   : > { %v368_v37 = vadd.f32 %v692_v34, %v671_v33 }
  0xfb   : > { %v281_v35 = vpop.f32.mrf.mxu0  ;;  %v362_v36 = vpop.f32.mrf.mxu1 }
  0xfc   : > { %v363_v39 = vadd.f32 %v362_v36, %v281_v35 }
 0x10c   : > { %v713_v38 = vpop.f32.mrf.mxu0 }
 0x10d   : > { %v465_v40 = vadd.f32 %v713_v38, %v368_v37 }
 0x10e   : > { %v455_v41 = vpop.f32.mrf.mxu0 }
 0x10f   : > { %v464_v42 = vadd.f32 %v455_v41, %v363_v39  ;;  %v486_v43 = vmul.f32 %v465_v40, %v465_v40 }
 0x111   : > { %v477_v44 = vadd.f32 %v465_v40, %v464_v42  ;;  %v485_v45 = vmul.f32 %v464_v42, %v464_v42 }
 0x113   : > { %v478_v46 = vrot.slane %v477_v44, 4  ;;  %v487_v47 = vadd.f32 %v486_v43, %v485_v45 }
 0x115   : > { %v479_v48 = vadd.f32 %v478_v46, %v477_v44  ;;  %v488_v49 = vrot.slane %v487_v47, 4 }
 0x117   : > { %v480_v50 = vrot.slane %v479_v48, 2  ;;  %v489_v51 = vadd.f32 %v488_v49, %v487_v47 }
 0x119   : > { %v481_v52 = vadd.f32 %v480_v50, %v479_v48  ;;  %v490_v53 = vrot.slane %v489_v51, 2 }
 0x11b   : > { %v482_v54 = vrot.slane %v481_v52, 1  ;;  %v491_v55 = vadd.f32 %v490_v53, %v489_v51 }
 0x11d   : > { %v483_v56 = vadd.f32 %v482_v54, %v481_v52  ;;  %v492_v57 = vrot.slane %v491_v55, 1 }
 0x11f   : > { %v493_v58 = vadd.f32 %v492_v57, %v491_v55  ;;  %484 = vst [vmem:[%s175_s20] sm:$0x1] %v483_v56 }
 0x121   : > { %494 = vst [vmem:[%s175_s20 + $0x1] sm:$0x1] %v493_v58 }
 0x122   : > { %822 = shalt.err (!%p819_p3)
}
 0x123   : > { %s823_s3 = scalar_lea.hbm %s508_s26, 32  ;;  %s827_s6 = scalar_lea.hbm %s1048_s2, 64 }
 0x124   : > { %p824_p5 = scmp.ne.s32.totalorder %s508_s26, %s823_s3  ;;  %p828_p9 = scmp.lt.s32.totalorder %s508_s26, %s1048_s2 }
 0x125   : > { %p829_p12 = scmp.lt.s32.totalorder %s827_s6, %s823_s3 }
 0x126   : > { %p825_p6 = pnand %p824_p5, %p950_p4 }
 0x127   : > { %p830_p10 = por %p829_p12, %p828_p9 }
 0x128   : > { %p826_p7 = pneg %p825_p6 }
 0x12a   : > { %p831_p11 = pnand %p830_p10, %p826_p7 }
 0x12c   : > { %834 = shalt.err (!%p831_p11)
}
 0x12d   : > { %719 = dma.vmem_to_hbm [thread:$0]  (%p950_p4), %s511_s23, 32, %s508_s26, %s496_s27  }
 0x12e PF: > { %p731_p13 = scmp.ge.s32.totalorder %s889_s14, 2  ;;  %s522_s15 = sand.u32 1, %s869_s9  }
 0x12f   : > { %s523_s16 = scalar_lea.sflag [#allocation4], %s522_s15 }
 0x130   : > { %p726_p0 = pnand %p731_p13, %p957_p8 }
 0x132   : > { %p727_p1 = pneg %p726_p0 }
 0x134   : > { %864 = dma.done.wait (%p727_p1), %s523_s16, 32  }
 0x135   : > { %866 = vsyncadd (%p727_p1), %s523_s16, 4294967264  ;;  %s16_s14 = sadd.s32 1, %s889_s14   ;;  %s1053_s9 = smov %s873_s10 }
 0x136   : > { %p13_p2 = scmp.ge.s32.totalorder %s16_s14, 4   ;;  %s1054_s10 = smov %s877_s11 }
 0x137   : > { %s1055_s11 = smov %s963_s22  ;;  %s1056_s12 = smov %s885_s13 }
 0x138   : > { %s1057_s13 = smov %s1059_s17  ;;  %15 = sbr.rel (!%p13_p2) target bundleno = 5 (0x5), region = 70 }
 0x13d   :  { %528 = vsyncpa [#allocation3], 1 }
 0x13e   :  { %530 = vsyncpa [#allocation3 + $0x1], 1 }
 0x13f   :  { %531 = vsyncpa [#allocation4], 1 }
 0x140   :  { %533 = vsyncpa [#allocation4 + $0x1], 1 }

</bundles_post_ra>
